<compile_context>
chip_gen: v7x
topology: tpu7x:2x2x1
jax: 0.10.0
libtpu: 0.0.40
codegen_flags: <defaults>
</compile_context>

<pallas_src>
import math

import jax
import jax.numpy as jnp
import numpy as np
from jax.experimental import pallas as pl
from jax.experimental.pallas import tpu as pltpu


# ---------------------------------------------------------------------------
# Path 1: true zero-copy identity — output aliases the donated input buffer.
# ---------------------------------------------------------------------------
def _alias_kernel(x_hbm_ref, o_hbm_ref, flag_ref):
    # The output buffer aliases the input buffer, so the data is already in
    # place: nothing to load, compute, or store.  The SMEM scalar store is a
    # zero-cost placeholder that keeps the lowered body non-empty; it touches
    # neither HBM operand and no side-effect flag is attached.
    del x_hbm_ref, o_hbm_ref
    flag_ref[0] = jnp.int32(0)


def _identity_aliased_call(x):
    return pl.pallas_call(
        _alias_kernel,
        out_shape=jax.ShapeDtypeStruct(x.shape, x.dtype),
        in_specs=[pl.BlockSpec(memory_space=pl.ANY)],   # raw HBM ref, no auto-DMA
        out_specs=pl.BlockSpec(memory_space=pl.ANY),    # raw HBM ref, no auto-DMA
        scratch_shapes=[pltpu.SMEM((1,), jnp.int32)],
        input_output_aliases={0: 0},                    # output aliases input 0
    )(x)


# donate_argnums=0 guarantees XLA honors the alias without inserting a
# defensive HBM->HBM copy: the call moves zero bytes.  The caller must not
# reuse `x` after this call.
_identity_aliased_jit = jax.jit(_identity_aliased_call, donate_argnums=0)


# ---------------------------------------------------------------------------
# Path 2: lane-dense tiled copy — fallback when the caller cannot donate x.
# ---------------------------------------------------------------------------
_BLOCK_BYTES_TARGET = 2 * 1024 * 1024   # ~2 MiB blocks: 2 operands x 2 buffers
                                        # = 8 MiB, well under v7x's 32 MiB
                                        # default scoped / 64 MiB physical VMEM.
_LANE_WIDTHS = (8192, 4096, 2048, 1024, 512, 256, 128)


def _copy_kernel(x_ref, o_ref):
    o_ref[...] = x_ref[...]


def _identity_tiled_copy(x):
    """Materialized copy at ~HBM roofline for the non-donated case."""
    total = math.prod(x.shape) if x.shape else 1
    if total == 0:
        return x
    itemsize = np.dtype(x.dtype).itemsize

    width = next((w for w in _LANE_WIDTHS if total % w == 0), None)
    if width is None:
        # Cannot form a lane-dense 2-D view (odd element count): single
        # full-array block copy.  Fine for small tensors; large tensors with
        # such sizes should prefer the donated zero-copy path.
        flat = x.reshape(1, total)
        out = pl.pallas_call(
            _copy_kernel,
            out_shape=jax.ShapeDtypeStruct(flat.shape, x.dtype),
        )(flat)
        return out.reshape(x.shape)

    rows = total // width
    x2 = x.reshape(rows, width)   # row-major flatten: layout-preserving view

    if rows * width * itemsize <= _BLOCK_BYTES_TARGET:
        block_rows = rows         # single block, full extent (always legal)
    else:
        block_rows = max(8, (_BLOCK_BYTES_TARGET // (width * itemsize)) // 8 * 8)

    grid = (pl.cdiv(rows, block_rows),)
    out = pl.pallas_call(
        _copy_kernel,
        out_shape=jax.ShapeDtypeStruct((rows, width), x.dtype),
        grid=grid,
        in_specs=[pl.BlockSpec((block_rows, width), lambda i: (i, 0))],
        out_specs=pl.BlockSpec((block_rows, width), lambda i: (i, 0)),
        compiler_params=pltpu.CompilerParams(
            # "parallel": on v7x the streaming copy shards across both
            # TensorCores; harmless no-op on single-TC v5e/v6e.
            dimension_semantics=("parallel",),
            # Explicit limit so v6e-tuned assumptions never overshoot v7x's
            # smaller VMEM.
            vmem_limit_bytes=32 * 1024 * 1024,
        ),
    )(x2)
    return out.reshape(x.shape)


# ---------------------------------------------------------------------------
# Public wrappers.
# ---------------------------------------------------------------------------
def identity(x):
    """Identity.forward(x) == x.

    Identity is a true no-op; returning the input is the optimum on every TPU
    generation (zero bytes moved, zero launch overhead).  Use identity_pallas
    only when a kernel boundary is explicitly required.
    """
    return x


def identity_pallas(x, *, donated=False):
    """Identity through a Pallas kernel (for when a kernel is mandated).

    donated=True : zero-copy — output aliases the (donated) input buffer;
                   the caller must not reuse `x` afterwards.
    donated=False: materialized lane-dense tiled copy at ~HBM roofline.
    """
    if donated:
        return _identity_aliased_jit(x)
    return _identity_tiled_copy(x)


if __name__ == "__main__":
    key = jax.random.PRNGKey(0)
    x = jax.random.normal(key, (2, 4, 16, 16), dtype=jnp.float32)
    x_host = np.asarray(x)            # host copy — survives donation of x

    # 1. Default path: true no-op (zero cost).
    y0 = identity(x)
    jax.block_until_ready(y0)
    assert y0.shape == x.shape and y0.dtype == x.dtype
    assert np.array_equal(np.asarray(y0), x_host), "identity() mismatch"

    # 2. Pallas tiled-copy path (non-donated caller).
    y1 = identity_pallas(x, donated=False)
    jax.block_until_ready(y1)
    assert y1.shape == x.shape and y1.dtype == x.dtype
    assert np.array_equal(np.asarray(y1), x_host), "tiled-copy mismatch"

    # 3. Pallas zero-copy aliased path (x donated; not reused afterwards).
    y2 = identity_pallas(x, donated=True)
    jax.block_until_ready(y2)
    assert y2.shape == x_host.shape and str(y2.dtype) == str(x_host.dtype)
    assert np.array_equal(np.asarray(y2), x_host), "aliased path mismatch"

    print("KERNEL_OK")
</pallas_src>

<mosaic_0001>
module attributes {stable_mosaic.version = 11 : i64} {
  func.func @_copy_kernel(%arg0: i32, %arg1: memref<1x2048xf32, #tpu.memory_space<vmem>>, %arg2: memref<1x2048xf32, #tpu.memory_space<vmem>>) attributes {dimension_semantics = [#tpu.dimension_semantics<parallel>], iteration_bounds = array<i64: 1>, scalar_prefetch = 0 : i64, scratch_operands = 0 : i64, tpu.core_type = #tpu.core_type<tc>, window_params = [{transform_indices = @transform_0, window_bounds = array<i64: 1, 2048>}, {transform_indices = @transform_1, window_bounds = array<i64: 1, 2048>}]} {
    %c0 = arith.constant 0 : index
    %c0_0 = arith.constant 0 : index
    %0 = vector.load %arg1[%c0, %c0_0] : memref<1x2048xf32, #tpu.memory_space<vmem>>, vector<1x2048xf32>
    %c0_1 = arith.constant 0 : index
    %c0_2 = arith.constant 0 : index
    %1 = vector.load %arg2[%c0_1, %c0_2] : memref<1x2048xf32, #tpu.memory_space<vmem>>, vector<1x2048xf32>
    tpu.vector_store %arg2[%c0_1, %c0_2], %0 {strides = array<i32>} : memref<1x2048xf32, #tpu.memory_space<vmem>>, vector<1x2048xf32>,
    return
  }
  func.func @transform_0(%arg0: i32) -> (i32, i32) {
    %c0_i32 = arith.constant 0 : i32
    %c0_i32_0 = arith.constant 0 : i32
    return %arg0, %c0_i32 : i32, i32
  }
  func.func @transform_1(%arg0: i32) -> (i32, i32) {
    %c0_i32 = arith.constant 0 : i32
    %c0_i32_0 = arith.constant 0 : i32
    return %arg0, %c0_i32 : i32, i32
  }
}

</mosaic_0001>

<bundles_post_ra>
// kernel: tpu_custom_call.1
= control target key start
LH: loop header
LB: loop body
LE: loop exit
PB: predicated region body
PF: predicated region fallthrough
CT: control target
= control target key end

     0   :  { %6 = vsyncpa [#allocation3], 0  ;;  %s126_s0 = inlined_call_operand.hbm [shape: f32[1,2048], index: 0, kind: input, shape index: {}]   ;;  %s127_s1 = inlined_call_operand.hbm [shape: f32[1,2048], index: 1, kind: output, shape index: {}]  }
   0x1   :  { %7 = vsyncpa [#allocation4], 0  ;;  %s90_s6 = smov [#allocation2]   ;;  %s42_s10 = scalar_lea.hbm %s126_s0, 256 }
   0x2   :  { %s14_s7 = sshll.u32 %s90_s6, 4  ;;  %p43_p0 = scmp.ne.s32.totalorder %s126_s0, %s42_s10  ;;  %s15_s7 = int_to_ptr.vmem [resolvable:$true] %s14_s7 }
   0x3   :  { %p46_p1 = scmp.lt.u32.totalorder %s42_s10, %s126_s0 }
   0x5   :  { %p48_p2 = pnand %p46_p1, %p43_p0 }
   0x7   :  { %51 = shalt.err (!%p48_p2)
}
   0x8   :  { %s52_s15 = scalar_lea.vmem %s15_s7, 256  ;;  %p57_p4 = scmp.lt.s32.totalorder %s15_s7, %s15_s7 }
   0x9   :  { %p53_p3 = scmp.ne.s32.totalorder %s15_s7, %s52_s15  ;;  %p58_p5 = scmp.lt.s32.totalorder %s52_s15, %s52_s15 }
   0xb   :  { %p59_p6 = por %p58_p5, %p57_p4 }
   0xd   :  { %p60_p7 = pnand %p59_p6, %p53_p3 }
   0xf   :  { %63 = shalt.err (!%p60_p7)
}
  0x10   :  { %17 = dma.hbm_to_vmem [thread:$0]  %s126_s0, 256, %s15_s7, [#allocation3]  }
  0x11   :  { %86 = dma.done.wait [#allocation3], 256  }
  0x12   :  { %87 = vsyncadd [#allocation3], 4294967040  ;;  %s91_s18 = smov [#allocation5]   ;;  %v21_v0 = vld [vmem:[#allocation2] sm:$0xff]  ;;  %v22_v1 = vld [vmem:[#allocation2 + $0x8] sm:$0xff] }
  0x13   :  { %s31_s19 = sshll.u32 %s91_s18, 4  ;;  %23 = vst [vmem:[#allocation5] sm:$0xff] %v21_v0  ;;  %24 = vst [vmem:[#allocation5 + $0x8] sm:$0xff] %v22_v1  ;;  %s32_s19 = int_to_ptr.vmem [resolvable:$true] %s31_s19 }
  0x14   :  { %s64_s20 = scalar_lea.vmem %s32_s19, 256  ;;  %p69_p9 = scmp.lt.s32.totalorder %s32_s19, %s32_s19 }
  0x15   :  { %p65_p8 = scmp.ne.s32.totalorder %s32_s19, %s64_s20  ;;  %p70_p10 = scmp.lt.s32.totalorder %s64_s20, %s64_s20 }
  0x17   :  { %p71_p11 = por %p70_p10, %p69_p9 }
  0x19   :  { %p72_p12 = pnand %p71_p11, %p65_p8 }
  0x1b   :  { %75 = shalt.err (!%p72_p12)
}
  0x1c   :  { %s76_s0 = scalar_lea.hbm %s127_s1, 256 }
  0x1d   :  { %p77_p13 = scmp.ne.s32.totalorder %s127_s1, %s76_s0  ;;  %p80_p0 = scmp.lt.u32.totalorder %s76_s0, %s127_s1 }
  0x1f   :  { %p82_p1 = pnand %p80_p0, %p77_p13 }
  0x21   :  { %85 = shalt.err (!%p82_p1)
}
  0x22   :  { %34 = dma.vmem_to_hbm [thread:$0]  %s32_s19, 256, %s127_s1, [#allocation4]  }
  0x23   :  { %88 = dma.done.wait [#allocation4], 256  }
  0x24   :  { %89 = vsyncadd [#allocation4], 4294967040 }
  0x25   :  { %38 = vsyncpa [#allocation3], 1 }
  0x26   :  { %39 = vsyncpa [#allocation4], 1 }

</bundles_post_ra>
